<compile_context>
chip_gen: v6e
topology: v6e:2x2x1
jax: 0.10.0
libtpu: 0.0.40
codegen_flags: <defaults>
</compile_context>

<pallas_src>
import functools
import math

import jax
import jax.numpy as jnp
from jax.experimental import pallas as pl
from jax.experimental.pallas import tpu as pltpu

LANE = 128
SUBLANE = 8


def _round_up(n, m):
    return ((n + m - 1) // m) * m


# ----------------------------- kernel ---------------------------------------


def dqn_mlp_kernel(x_ref, w1_ref, w23_ref, b_ref, o_ref, *, hp, ap):
    """Fused 3-layer MLP on one [TB, S] batch tile; weights stay VMEM-resident."""
    cdt = w1_ref.dtype                      # bf16 MXU-input dtype
    x = x_ref[...].astype(cdt)              # f32 -> bf16 cast inside the kernel

    # Layer 1: Linear + ReLU (f32 accumulation, f32 elementwise)
    h1 = jnp.dot(x, w1_ref[...], preferred_element_type=jnp.float32)
    h1 = jnp.maximum(h1 + b_ref[:, 0:hp], 0.0)

    # Layer 2: Linear + ReLU (w2 is the left half of the packed w23 buffer)
    h2 = jnp.dot(h1.astype(cdt), w23_ref[:, 0:hp],
                 preferred_element_type=jnp.float32)
    h2 = jnp.maximum(h2 + b_ref[:, hp:2 * hp], 0.0)

    # Layer 3: Linear (no activation); lane-dense bf16 store
    out = jnp.dot(h2.astype(cdt), w23_ref[:, hp:hp + ap],
                  preferred_element_type=jnp.float32)
    o_ref[...] = (out + b_ref[:, 2 * hp:2 * hp + ap]).astype(o_ref.dtype)


# ----------------------------- wrapper ---------------------------------------


def prepare_params(params, compute_dtype=jnp.bfloat16):
    """Pad hidden/action dims to 128 lanes, keep S unpadded, pack w2|w3 and biases."""
    w1, b1, w2, b2, w3, b3 = (params[k] for k in ("w1", "b1", "w2", "b2", "w3", "b3"))
    S, H = w1.shape
    A = w3.shape[1]
    Hp, Ap = _round_up(H, LANE), _round_up(A, LANE)

    # w1 keeps its real row count S (contraction dim); only columns pad to Hp.
    w1p = jnp.zeros((S, Hp), compute_dtype).at[:, :H].set(w1.astype(compute_dtype))
    w2p = jnp.zeros((Hp, Hp), compute_dtype).at[:H, :H].set(w2.astype(compute_dtype))
    w3p = jnp.zeros((Hp, Ap), compute_dtype).at[:H, :A].set(w3.astype(compute_dtype))
    w23 = jnp.concatenate([w2p, w3p], axis=1)          # [Hp, Hp + Ap]

    # Biases packed along lanes at 128-aligned offsets: [b1 | b2 | b3].
    b = jnp.zeros((1, 2 * Hp + Ap), jnp.float32)
    b = b.at[:, 0:H].set(b1.astype(jnp.float32))
    b = b.at[:, Hp:Hp + H].set(b2.astype(jnp.float32))
    b = b.at[:, 2 * Hp:2 * Hp + A].set(b3.astype(jnp.float32))

    return {"w1": w1p, "w23": w23, "b": b, "dims": (S, H, A, Hp, Ap)}


def dqn_forward(x, prepared, action_size, *, tb=2048):
    """x: [batch, state_size] f32; prepared: output of prepare_params."""
    w1, w23, b = prepared["w1"], prepared["w23"], prepared["b"]
    S, H, A, Hp, Ap = prepared["dims"]
    B, Sx = x.shape
    assert Sx == S and action_size <= Ap

    # Batch tile: big enough to amortize the ~0.35 us/grid-step overhead, but
    # split into >= 2 grid steps when possible so both v7x TensorCores work.
    B8 = _round_up(B, SUBLANE)
    TB = _round_up(max(SUBLANE, min(tb, B8)), SUBLANE)
    if TB == B8 and B8 >= 2 * SUBLANE:
        TB = _round_up(pl.cdiv(B8, 2), SUBLANE)
    Bp = _round_up(B, TB)

    # Only the batch dim is padded (cheap); x stays f32 and S-unpadded.
    xb = x if Bp == B else jnp.pad(x, ((0, Bp - B), (0, 0)))

    # Real (unpadded) work for the scheduler, not padded-dim work.
    flops = 2 * B * (S * H + H * H + H * A)
    bytes_accessed = (
        B * S * 4                                             # x (f32)
        + (S * H + H * H + H * A) * jnp.dtype(w1.dtype).itemsize  # weights (bf16)
        + (2 * H + A) * 4                                     # biases (f32)
        + B * A * 2                                           # output (bf16)
    )

    kernel = functools.partial(dqn_mlp_kernel, hp=Hp, ap=Ap)

    out_padded = pl.pallas_call(
        kernel,
        out_shape=jax.ShapeDtypeStruct((Bp, Ap), jnp.bfloat16),
        grid=(Bp // TB,),
        in_specs=[
            pl.BlockSpec((TB, S), lambda i: (i, 0)),            # x tile (f32, S unpadded)
            pl.BlockSpec((S, Hp), lambda i: (0, 0)),            # w1 (VMEM-resident)
            pl.BlockSpec((Hp, Hp + Ap), lambda i: (0, 0)),      # w2|w3 packed (resident)
            pl.BlockSpec((1, 2 * Hp + Ap), lambda i: (0, 0)),   # b1|b2|b3 packed (resident)
        ],
        out_specs=pl.BlockSpec((TB, Ap), lambda i: (i, 0)),
        compiler_params=pltpu.CompilerParams(
            dimension_semantics=("parallel",),
            vmem_limit_bytes=32 * 1024 * 1024,
        ),
        cost_estimate=pl.CostEstimate(
            flops=int(flops), transcendentals=0, bytes_accessed=int(bytes_accessed)
        ),
    )(xb, w1, w23, b)

    return out_padded[:B, :action_size].astype(jnp.float32)


# ----------------------------- init / reference ------------------------------


def kaiming_uniform(key, fan_in, shape):
    # Matches torch.nn.init.kaiming_uniform_(w): a=0, fan_in, leaky_relu ->
    # gain=sqrt(2), bound = sqrt(6/fan_in).
    bound = math.sqrt(2.0) * math.sqrt(3.0 / fan_in)
    return jax.random.uniform(key, shape, jnp.float32, minval=-bound, maxval=bound)


def init_params(key, state_size, hidden, action_size):
    keys = jax.random.split(key, 6)
    # PyTorch Linear weight is [out, in]; stored transposed [in, out] for x @ W.
    w1 = kaiming_uniform(keys[0], state_size, (state_size, hidden))
    w2 = kaiming_uniform(keys[1], hidden, (hidden, hidden))
    w3 = kaiming_uniform(keys[2], hidden, (hidden, action_size))

    # Biases keep nn.Linear's default init: U(-1/sqrt(fan_in), 1/sqrt(fan_in)).
    def bias(k, fan_in, out):
        b = 1.0 / math.sqrt(fan_in)
        return jax.random.uniform(k, (1, out), jnp.float32, minval=-b, maxval=b)

    return {
        "w1": w1, "b1": bias(keys[3], state_size, hidden),
        "w2": w2, "b2": bias(keys[4], hidden, hidden),
        "w3": w3, "b3": bias(keys[5], hidden, action_size),
    }


def reference_forward(x, p, compute_dtype=jnp.bfloat16):
    # Mirrors the kernel's quantization: bf16 matmul inputs, f32 accumulate,
    # f32 bias/ReLU. (Kernel additionally stores the output through bf16.)
    q = lambda a: a.astype(compute_dtype).astype(jnp.float32)
    h1 = jnp.maximum(q(x) @ q(p["w1"]) + p["b1"], 0.0)
    h2 = jnp.maximum(q(h1) @ q(p["w2"]) + p["b2"], 0.0)
    return q(h2) @ q(p["w3"]) + p["b3"]


if __name__ == "__main__":
    batch, state_size, hidden, action_size = 4, 8, 32, 4

    key = jax.random.PRNGKey(0)
    k_params, k_x = jax.random.split(key)
    params = init_params(k_params, state_size, hidden, action_size)
    prepared = prepare_params(params)
    x = jax.random.normal(k_x, (batch, state_size), jnp.float32)

    out = dqn_forward(x, prepared, action_size)
    out = jax.block_until_ready(out)

    ref = reference_forward(x, params)
    assert out.shape == (batch, action_size), out.shape
    assert jnp.allclose(out, ref, atol=1e-2, rtol=1e-2), jnp.max(jnp.abs(out - ref))

    print("KERNEL_OK")
</pallas_src>

<mosaic_0001>
module attributes {stable_mosaic.version = 11 : i64} {
  func.func @dqn_mlp_kernel(%arg0: i32, %arg1: memref<8x8xf32, #tpu.memory_space<vmem>>, %arg2: memref<8x128xbf16, #tpu.memory_space<vmem>>, %arg3: memref<128x256xbf16, #tpu.memory_space<vmem>>, %arg4: memref<1x384xf32, #tpu.memory_space<vmem>>, %arg5: memref<8x128xbf16, #tpu.memory_space<vmem>>) attributes {dimension_semantics = [#tpu.dimension_semantics<parallel>], iteration_bounds = array<i64: 1>, scalar_prefetch = 0 : i64, scratch_operands = 0 : i64, tpu.core_type = #tpu.core_type<tc>, window_params = [{transform_indices = @transform_0, window_bounds = array<i64: 8, 8>}, {pipeline_mode = #tpu.pipeline_mode<synchronous>, transform_indices = @transform_1, window_bounds = array<i64: 8, 128>}, {pipeline_mode = #tpu.pipeline_mode<synchronous>, transform_indices = @transform_2, window_bounds = array<i64: 128, 256>}, {pipeline_mode = #tpu.pipeline_mode<synchronous>, transform_indices = @transform_3, window_bounds = array<i64: 1, 384>}, {transform_indices = @transform_4, window_bounds = array<i64: 8, 128>}]} {
    %c0 = arith.constant 0 : index
    %c0_0 = arith.constant 0 : index
    %0 = vector.load %arg1[%c0, %c0_0] : memref<8x8xf32, #tpu.memory_space<vmem>>, vector<8x8xf32>
    %1 = arith.truncf %0 : vector<8x8xf32> to vector<8x8xbf16>
    %c0_1 = arith.constant 0 : index
    %c0_2 = arith.constant 0 : index
    %2 = vector.load %arg2[%c0_1, %c0_2] : memref<8x128xbf16, #tpu.memory_space<vmem>>, vector<8x128xbf16>
    %cst = arith.constant dense<0.000000e+00> : vector<8x128xf32>
    %3 = tpu.matmul %1, %2, %cst {dimension_numbers = #tpu.dot_dimension_numbers<[1], [0], [0], [1], [0, 0, 1, 1], [], []>} : vector<8x8xbf16>, vector<8x128xbf16>, vector<8x128xf32> -> vector<8x128xf32>
    %c0_3 = arith.constant 0 : index
    %c0_4 = arith.constant 0 : index
    %4 = vector.load %arg4[%c0_3, %c0_4] : memref<1x384xf32, #tpu.memory_space<vmem>>, vector<1x128xf32>
    %5 = vector.broadcast %4 : vector<1x128xf32> to vector<8x128xf32>
    %6 = arith.addf %3, %5 : vector<8x128xf32>
    %cst_5 = arith.constant 0.000000e+00 : f32
    %7 = vector.broadcast %cst_5 : f32 to vector<8x128xf32>
    %8 = arith.maximumf %6, %7 : vector<8x128xf32>
    %9 = arith.truncf %8 : vector<8x128xf32> to vector<8x128xbf16>
    %c0_6 = arith.constant 0 : index
    %c0_7 = arith.constant 0 : index
    %10 = vector.load %arg3[%c0_6, %c0_7] : memref<128x256xbf16, #tpu.memory_space<vmem>>, vector<128x128xbf16>
    %cst_8 = arith.constant dense<0.000000e+00> : vector<8x128xf32>
    %11 = tpu.matmul %9, %10, %cst_8 {dimension_numbers = #tpu.dot_dimension_numbers<[1], [0], [0], [1], [0, 0, 1, 1], [], []>} : vector<8x128xbf16>, vector<128x128xbf16>, vector<8x128xf32> -> vector<8x128xf32>
    %c0_9 = arith.constant 0 : index
    %c128 = arith.constant 128 : index
    %12 = vector.load %arg4[%c0_9, %c128] : memref<1x384xf32, #tpu.memory_space<vmem>>, vector<1x128xf32>
    %13 = vector.broadcast %12 : vector<1x128xf32> to vector<8x128xf32>
    %14 = arith.addf %11, %13 : vector<8x128xf32>
    %cst_10 = arith.constant 0.000000e+00 : f32
    %15 = vector.broadcast %cst_10 : f32 to vector<8x128xf32>
    %16 = arith.maximumf %14, %15 : vector<8x128xf32>
    %17 = arith.truncf %16 : vector<8x128xf32> to vector<8x128xbf16>
    %c0_11 = arith.constant 0 : index
    %c128_12 = arith.constant 128 : index
    %18 = vector.load %arg3[%c0_11, %c128_12] : memref<128x256xbf16, #tpu.memory_space<vmem>>, vector<128x128xbf16>
    %cst_13 = arith.constant dense<0.000000e+00> : vector<8x128xf32>
    %19 = tpu.matmul %17, %18, %cst_13 {dimension_numbers = #tpu.dot_dimension_numbers<[1], [0], [0], [1], [0, 0, 1, 1], [], []>} : vector<8x128xbf16>, vector<128x128xbf16>, vector<8x128xf32> -> vector<8x128xf32>
    %c0_14 = arith.constant 0 : index
    %c256 = arith.constant 256 : index
    %20 = vector.load %arg4[%c0_14, %c256] : memref<1x384xf32, #tpu.memory_space<vmem>>, vector<1x128xf32>
    %21 = vector.broadcast %20 : vector<1x128xf32> to vector<8x128xf32>
    %22 = arith.addf %19, %21 : vector<8x128xf32>
    %23 = arith.truncf %22 : vector<8x128xf32> to vector<8x128xbf16>
    %c0_15 = arith.constant 0 : index
    %c0_16 = arith.constant 0 : index
    %24 = vector.load %arg5[%c0_15, %c0_16] : memref<8x128xbf16, #tpu.memory_space<vmem>>, vector<8x128xbf16>
    tpu.vector_store %arg5[%c0_15, %c0_16], %23 {strides = array<i32>} : memref<8x128xbf16, #tpu.memory_space<vmem>>, vector<8x128xbf16>,
    return
  }
  func.func @transform_0(%arg0: i32) -> (i32, i32) {
    %c0_i32 = arith.constant 0 : i32
    %c0_i32_0 = arith.constant 0 : i32
    return %arg0, %c0_i32 : i32, i32
  }
  func.func @transform_1(%arg0: i32) -> (i32, i32) {
    %c0_i32 = arith.constant 0 : i32
    %c0_i32_0 = arith.constant 0 : i32
    %c0_i32_1 = arith.constant 0 : i32
    return %c0_i32, %c0_i32_0 : i32, i32
  }
  func.func @transform_2(%arg0: i32) -> (i32, i32) {
    %c0_i32 = arith.constant 0 : i32
    %c0_i32_0 = arith.constant 0 : i32
    %c0_i32_1 = arith.constant 0 : i32
    return %c0_i32, %c0_i32_0 : i32, i32
  }
  func.func @transform_3(%arg0: i32) -> (i32, i32) {
    %c0_i32 = arith.constant 0 : i32
    %c0_i32_0 = arith.constant 0 : i32
    %c0_i32_1 = arith.constant 0 : i32
    return %c0_i32, %c0_i32_0 : i32, i32
  }
  func.func @transform_4(%arg0: i32) -> (i32, i32) {
    %c0_i32 = arith.constant 0 : i32
    %c0_i32_0 = arith.constant 0 : i32
    return %arg0, %c0_i32 : i32, i32
  }
}

</mosaic_0001>

<bundles_post_ra>
// kernel: tpu_custom_call.1
= control target key start
LH: loop header
LB: loop body
LE: loop exit
PB: predicated region body
PF: predicated region fallthrough
CT: control target
= control target key end

     0   :  { %9 = vsyncpa [#allocation3], 0  ;;  %s631_s0 = inlined_call_operand.hbm [shape: f32[8,8], index: 0, kind: input, shape index: {}]   ;;  %s632_s1 = inlined_call_operand.hbm [shape: bf16[8,128], index: 1, kind: input, shape index: {}]   ;;  %s633_s2 = inlined_call_operand.hbm [shape: bf16[128,256], index: 2, kind: input, shape index: {}]   ;;  %s634_s3 = inlined_call_operand.vmem [shape: f32[1,384], index: 3, kind: input, shape index: {}]   ;;  %s635_s4 = inlined_call_operand.hbm [shape: bf16[8,128], index: 4, kind: output, shape index: {}]  }
   0x1   :  { %10 = vsyncpa [#allocation6], 0 }
   0x2   :  { %11 = vsyncpa [#allocation4], 0  ;;  %s554_s15 = smov [#allocation5]   ;;  %s555_s17 = smov [#allocation2]  }
   0x3   :  { %s28_s16 = sshll.u32 %s554_s15, 4  ;;  %s18_s18 = sshll.u32 %s555_s17, 4  ;;  %s29_s16 = int_to_ptr.vmem [resolvable:$true] %s28_s16  ;;  %s19_s18 = int_to_ptr.vmem [resolvable:$true] %s18_s18 }
   0x4   :  { %s476_s19 = scalar_lea.vmem %s29_s16, 64  ;;  %p481_p1 = scmp.lt.s32.totalorder %s29_s16, %s29_s16 }
   0x5   :  { %p477_p0 = scmp.ne.s32.totalorder %s29_s16, %s476_s19  ;;  %p482_p2 = scmp.lt.s32.totalorder %s476_s19, %s476_s19 }
   0x7   :  { %p483_p3 = por %p482_p2, %p481_p1 }
   0x9   :  { %p484_p4 = pnand %p483_p3, %p477_p0 }
   0xb   :  { %487 = shalt.err (!%p484_p4)
}
   0xc   :  { %31 = dma.hbm_to_vmem [thread:$0]  %s632_s1, 64, %s29_s16, [#allocation6]  }
   0xd   :  { %s496_s22 = scalar_lea.vmem %s19_s18, 128  ;;  %p501_p6 = scmp.lt.s32.totalorder %s19_s18, %s19_s18 }
   0xe   :  { %p497_p5 = scmp.ne.s32.totalorder %s19_s18, %s496_s22  ;;  %p502_p7 = scmp.lt.s32.totalorder %s496_s22, %s496_s22 }
  0x10   :  { %p503_p8 = por %p502_p7, %p501_p6 }
  0x12   :  { %p504_p9 = pnand %p503_p8, %p497_p5 }
  0x14   :  { %507 = shalt.err (!%p504_p9)
}
  0x15   :  { %21 = dma.hbm_to_vmem [thread:$0]  %s631_s0, 128, %s19_s18, [#allocation3]  }
  0x16   :  { %s556_s25 = smov [#allocation7]  }
  0x17   :  { %s37_s26 = sshll.u32 %s556_s25, 4  ;;  %s38_s26 = int_to_ptr.vmem [resolvable:$true] %s37_s26 }
  0x18   :  { %s516_s27 = scalar_lea.vmem %s38_s26, 2048  ;;  %p521_p11 = scmp.lt.s32.totalorder %s38_s26, %s38_s26 }
  0x19   :  { %p517_p10 = scmp.ne.s32.totalorder %s38_s26, %s516_s27  ;;  %p522_p12 = scmp.lt.s32.totalorder %s516_s27, %s516_s27 }
  0x1b   :  { %p523_p13 = por %p522_p12, %p521_p11 }
  0x1d   :  { %p524_p0 = pnand %p523_p13, %p517_p10 }
  0x1f   :  { %527 = shalt.err (!%p524_p0)
}
  0x20   :  { %s557_s1 = smov 128   ;;  %s558_s28 = smov 8  }
  0x21   :  { %43 = dma.hbm_to_vmem [thread:$0]  %s633_s2, 2048, %s38_s26, [#allocation6], %s557_s1, %s557_s1, %s558_s28  }
  0x22   :  { %548 = dma.done.wait [#allocation3], 128  }
  0x23   :  { %549 = vsyncadd [#allocation3], 4294967168 }
  0x24   :  { %550 = dma.done.wait [#allocation6], 2112  }
  0x25   :  { %551 = vsyncadd [#allocation6], 4294965184  ;;  %v559_v0 = vmov 0.0   ;;  %vm560_vm0 = vmmov 0   ;;  %vm70_vm1 = vcmask 1043456   ;;  %v56_v2 = vld [vmem:[#allocation2] sm:$0xff] }
  0x26   :  { %398 = vmatprep.subr.bf16.mxu0 %v559_v0  ;;  %400 = vmatprep.mubr.msk.bf16.mxu0 %vm560_vm0, %v559_v0  ;;  %v58_v1 = vld [vmem:[#allocation5] sm:$0xf]  ;;  %v57_v4 = vpack.c.bf16 %v56_v2, %v56_v2  ;;  %v452_v5 = vld [vmem:[#allocation7 + $0x70] ss:$8 sps:$4 sm:$0xff]   ;;  %vm66_vm2 = vcmask 64512   ;;  %s561_s9 = smov [#allocation8]  }
  0x27   :  { %404 = vmatprep.subr.bf16.mxu1 %v559_v0  ;;  %420 = vmatprep.mubr.msk.bf16.mxu1 %vm560_vm0, %v559_v0  ;;  %v72_v3 = vsel %vm70_vm1, %v58_v1, 0  ;;  %v453_v6 = vld [vmem:[#allocation7 + $0x60] ss:$8 sps:$4 sm:$0xff]   ;;  %v454_v7 = vld [vmem:[#allocation7 + $0x50] ss:$8 sps:$4 sm:$0xff]   ;;  %s348_s10 = sshll.u32 %s561_s9, 4  ;;  %s349_s10 = int_to_ptr.vmem [resolvable:$true] %s348_s10 }
  0x28   :  { %399 = vmatpush3.bf16.msra.mxu0 %v72_v3  ;;  %405 = vmatpush3.bf16.msra.mxu1 %v452_v5  ;;  %v455_v8 = vld [vmem:[#allocation7 + $0x40] ss:$8 sps:$4 sm:$0xff]   ;;  %v456_v9 = vld [vmem:[#allocation7 + $0x30] ss:$8 sps:$4 sm:$0xff]   ;;  %v460_v13 = vld [vmem:[#allocation7 + $0x74] ss:$8 sps:$4 sm:$0xff]   ;;  %p533_p2 = scmp.lt.s32.totalorder %s349_s10, %s349_s10 }
  0x29   :  { %424 = vmatprep.subr.bf16.mxu0 %v559_v0  ;;  %406 = vmatprep.subr.bf16.mxu1 %v559_v0  ;;  %v457_v10 = vld [vmem:[#allocation7 + $0x20] ss:$8 sps:$4 sm:$0xff]   ;;  %v458_v11 = vld [vmem:[#allocation7 + $0x10] ss:$8 sps:$4 sm:$0xff]   ;;  %v461_v14 = vld [vmem:[#allocation7 + $0x64] ss:$8 sps:$4 sm:$0xff]  }
  0x2a   :  { %v459_v12 = vld [vmem:[#allocation7] ss:$8 sps:$4 sm:$0xff]   ;;  %v462_v15 = vld [vmem:[#allocation7 + $0x54] ss:$8 sps:$4 sm:$0xff]   ;;  %v463_v16 = vld [vmem:[#allocation7 + $0x44] ss:$8 sps:$4 sm:$0xff]  }
  0x2b   :  { %401 = vmatmul.mubr.msk.bf16.vlgmr.msra.gmra.mxu0 %vm66_vm2, %v57_v4  ;;  %v464_v17 = vld [vmem:[#allocation7 + $0x34] ss:$8 sps:$4 sm:$0xff]   ;;  %v465_v18 = vld [vmem:[#allocation7 + $0x24] ss:$8 sps:$4 sm:$0xff]   ;;  %s528_s11 = scalar_lea.vmem %s349_s10, 64 }
  0x2c   :  { %440 = vmatprep.mubr.msk.bf16.mxu0 %vm560_vm0, %v559_v0  ;;  %407 = vmatpush3.bf16.msra.mxu1 %v453_v6  ;;  %v358_v19 = vld [vmem:[%s634_s3] ss:$0 sm:$0xff]  ;;  %v467_v28 = vld [vmem:[#allocation7 + $0x4] ss:$8 sps:$4 sm:$0xff]   ;;  %v360_v29 = vld [vmem:[%s634_s3 + $0x1] ss:$0 sm:$0xff]  ;;  %p529_p1 = scmp.ne.s32.totalorder %s349_s10, %s528_s11  ;;  %p534_p3 = scmp.lt.s32.totalorder %s528_s11, %s528_s11 }
  0x2d   :  { %408 = vmatprep.subr.bf16.mxu1 %v559_v0  ;;  %425 = vmatpush3.bf16.msra.mxu0 %v460_v13  ;;  %v466_v27 = vld [vmem:[#allocation7 + $0x14] ss:$8 sps:$4 sm:$0xff]  }
  0x2e   :  { %426 = vmatprep.subr.bf16.mxu0 %v559_v0  ;;  %v369_v37 = vld [vmem:[%s634_s3 + $0x2] ss:$0 sm:$0xff]  ;;  %p535_p4 = por %p534_p3, %p533_p2 }
  0x30   :  { %409 = vmatpush3.bf16.msra.mxu1 %v454_v7  ;;  %p536_p5 = pnand %p535_p4, %p529_p1 }
  0x31   :  { %410 = vmatprep.subr.bf16.mxu1 %v559_v0  ;;  %427 = vmatpush3.bf16.msra.mxu0 %v461_v14 }
  0x32   :  { %428 = vmatprep.subr.bf16.mxu0 %v559_v0 }
  0x34   :  { %411 = vmatpush3.bf16.msra.mxu1 %v455_v8 }
  0x35   :  { %412 = vmatprep.subr.bf16.mxu1 %v559_v0  ;;  %429 = vmatpush3.bf16.msra.mxu0 %v462_v15 }
  0x36   :  { %430 = vmatprep.subr.bf16.mxu0 %v559_v0 }
  0x38   :  { %413 = vmatpush3.bf16.msra.mxu1 %v456_v9 }
  0x39   :  { %414 = vmatprep.subr.bf16.mxu1 %v559_v0  ;;  %431 = vmatpush3.bf16.msra.mxu0 %v463_v16 }
  0x3a   :  { %432 = vmatprep.subr.bf16.mxu0 %v559_v0 }
  0x3c   :  { %415 = vmatpush3.bf16.msra.mxu1 %v457_v10 }
  0x3d   :  { %416 = vmatprep.subr.bf16.mxu1 %v559_v0  ;;  %433 = vmatpush3.bf16.msra.mxu0 %v464_v17 }
  0x3e   :  { %434 = vmatprep.subr.bf16.mxu0 %v559_v0 }
  0x40   :  { %417 = vmatpush3.bf16.msra.mxu1 %v458_v11 }
  0x41   :  { %418 = vmatprep.subr.bf16.mxu1 %v559_v0  ;;  %435 = vmatpush3.bf16.msra.mxu0 %v465_v18 }
  0x42   :  { %436 = vmatprep.subr.bf16.mxu0 %v559_v0 }
  0x44   :  { %419 = vmatpush3.bf16.msra.mxu1 %v459_v12 }
  0x45   :  { %437 = vmatpush3.bf16.msra.mxu0 %v466_v27 }
  0x46   :  { %438 = vmatprep.subr.bf16.mxu0 %v559_v0 }
  0x49   :  { %439 = vmatpush3.bf16.msra.mxu0 %v467_v28 }
  0xeb   :  { %v108_v20 = vpop.f32.mrf.mxu0 }
  0xec   :  { %v109_v21 = vadd.f32 %v358_v19, %v108_v20 }
  0xed   :  { %v402_v22 = vpop.f32.mrf.mxu0 }
  0xee   :  { %v114_v23 = vmax.f32 %v109_v21, 0.0 }
  0xef   :  { %v111_v24 = vpop.f32.mrf.mxu0 }
  0xf0   :  { %v115_v25 = vpack.c.bf16 %v114_v23, %v114_v23 }
  0xf1   :  { %v403_v26 = vpop.f32.mrf.mxu0 }
  0xf2   :  { %421 = vmatmul.mubr.bf16.vlgmr.msra.gmra.mxu1 %v115_v25 }
 0x1b2   :  { %v221_v30 = vpop.f32.mrf.mxu1 }
 0x1b3   :  { %v222_v31 = vadd.f32 %v360_v29, %v221_v30 }
 0x1b4   :  { %v422_v32 = vpop.f32.mrf.mxu1 }
 0x1b5   :  { %v227_v33 = vmax.f32 %v222_v31, 0.0 }
 0x1b6   :  { %v224_v34 = vpop.f32.mrf.mxu1 }
 0x1b7   :  { %v228_v35 = vpack.c.bf16 %v227_v33, %v227_v33 }
 0x1b8   :  { %v423_v36 = vpop.f32.mrf.mxu1 }
 0x1b9   :  { %441 = vmatmul.mubr.bf16.vlgmr.msra.gmra.mxu0 %v228_v35 }
 0x279   :  { %v334_v38 = vpop.f32.mrf.mxu0 }
 0x27a   :  { %v335_v39 = vadd.f32 %v369_v37, %v334_v38 }
 0x27b   :  { %v442_v40 = vpop.f32.mrf.mxu0 }
 0x27c   :  { %v340_v41 = vpack.c.bf16 %v335_v39, %v335_v39 }
 0x27d   :  { %v337_v42 = vpop.f32.mrf.mxu0 }
 0x27e   :  { %341 = vst [vmem:[#allocation8] sm:$0xf] %v340_v41 }
 0x27f   :  { %v443_v43 = vpop.f32.mrf.mxu0 }
 0x280   :  { %539 = shalt.err (!%p536_p5)
}
 0x281   :  { %351 = dma.vmem_to_hbm [thread:$0]  %s349_s10, 64, %s635_s4, [#allocation4]  }
 0x282   :  { %552 = dma.done.wait [#allocation4], 64  }
 0x283   :  { %553 = vsyncadd [#allocation4], 4294967232 }
 0x284   :  { %355 = vsyncpa [#allocation3], 1 }
 0x285   :  { %356 = vsyncpa [#allocation6], 1 }
 0x286   :  { %357 = vsyncpa [#allocation4], 1 }

</bundles_post_ra>
